<compile_context>
chip_gen: v5e
topology: v5e:2x2
jax: 0.10.0
libtpu: 0.0.40
codegen_flags: <defaults>
</compile_context>

<pallas_src>
import functools

import jax
import jax.numpy as jnp
from jax.experimental import pallas as pl
from jax.experimental.pallas import tpu as pltpu

BIT = 8
SYMMETRIC = False  # module default
QUANT_MIN = -(2 ** (BIT - 1)) if SYMMETRIC else 0
QUANT_MAX = (2 ** (BIT - 1) - 1) if SYMMETRIC else (2 ** BIT - 1)
EPS = float(jnp.finfo(jnp.float32).eps)

_MIB = 1024 * 1024


def _round_up(n, m):
    return ((n + m - 1) // m) * m


def _cdiv(a, b):
    return -(-a // b)


def _vmem_capacity_bytes():
    """Per-TensorCore VMEM capacity; chip-aware fallback if the query fails."""
    try:
        cap = int(pltpu.get_tpu_info().vmem_capacity_bytes)
        if cap > 0:
            return cap
    except Exception:
        pass
    try:
        kind = jax.devices()[0].device_kind.lower()
        if "v7" in kind:
            return 64 * _MIB
    except Exception:
        pass
    return 128 * _MIB  # v5e / v6e


def _num_tensorcores():
    """TensorCores sharing the 'parallel' grid axis (2 on v7x, 1 on v5e/v6e)."""
    try:
        info = pltpu.get_tpu_info()
        for attr in ("num_cores", "tensorcore_count", "num_tensorcores", "core_count"):
            v = getattr(info, attr, None)
            if v:
                return int(v)
    except Exception:
        pass
    try:
        if "v7" in jax.devices()[0].device_kind.lower():
            return 2
    except Exception:
        pass
    return 1


def _pick_block_tokens(t, h, in_itemsize, out_itemsize, vmem_cap, num_cores):
    """Largest token tile whose pipelined working set fits the VMEM budget."""
    # Per grid step: in + out blocks, double-buffered, plus ~1 f32 temp / element.
    bytes_per_row = h * (2 * (in_itemsize + out_itemsize) + 4)
    frac = 0.65 if vmem_cap >= 96 * _MIB else 0.45  # v5e/v6e vs v7x headroom
    budget = int(vmem_cap * frac)
    bt = budget // max(bytes_per_row, 1)
    bt = max(8, min(8192, (bt // 8) * 8))
    t8 = _round_up(t, 8)
    bt = min(bt, t8)
    # Only force a split when there is more than one TensorCore and enough work;
    # then round the step count to a multiple of the core count for balance.
    if num_cores > 1 and t8 > 8 * num_cores:
        steps = _cdiv(t, bt)
        steps = _round_up(max(steps, num_cores), num_cores)
        bt = max(8, _round_up(_cdiv(t, steps), 8))
    return bt


def _token_fake_quant_kernel(x_ref, o_ref, *, quant_min, quant_max, symmetric):
    """One block = [BLOCK_TOKENS, H]; per-row observer + fake quant."""
    # Pass 1: per-row min/max (MinMaxObserver over the hidden dim). The cast
    # fuses into the reduction; no full-tile f32 copy needs to survive to pass 2.
    # (On v6e/v7x the reduction could also run on the native bf16 VALU; kept in
    # f32 for portability to v5e.)
    xf = x_ref[...].astype(jnp.float32)
    min_neg = jnp.minimum(jnp.min(xf, axis=-1, keepdims=True), 0.0)
    max_pos = jnp.maximum(jnp.max(xf, axis=-1, keepdims=True), 0.0)
    qrange = float(quant_max - quant_min)

    if symmetric:
        # Dead under module defaults; integer zero_point per torch MinMaxObserver.
        amax = jnp.maximum(-min_neg, max_pos)
        scale = jnp.maximum(amax / (qrange / 2.0), EPS)
        if quant_min <= 0 <= quant_max:
            zp = jnp.zeros_like(scale)
        else:
            zp = jnp.full_like(scale, float((quant_min + quant_max + 1) // 2))
    else:
        scale = jnp.maximum((max_pos - min_neg) / qrange, EPS)
        zp = jnp.clip(float(quant_min) - jnp.round(min_neg / scale),
                      float(quant_min), float(quant_max))

    # True per-row divide ([bt, 1] only) keeps bit-parity with the torch divide
    # path; the [bt, H] hot loop then sees a single VPU multiply.
    inv_scale = 1.0 / scale

    # Pass 2: re-read x_ref so the (bf16->f32) cast fuses into the quant chain.
    x2 = x_ref[...].astype(jnp.float32)
    q = jnp.clip(jnp.round(x2 * inv_scale + zp), float(quant_min), float(quant_max))
    o_ref[...] = ((q - zp) * scale).astype(o_ref.dtype)


def token_fixed_fake_quantize(
    x,
    *,
    observer_enabled=1,
    fake_quant_enabled=1,
    block_tokens=None,
):
    """JAX wrapper mirroring TokenFixedFakeQuantize.forward."""
    if not observer_enabled and not fake_quant_enabled:
        return x
    org_shape = x.shape
    h = org_shape[-1]
    x2 = x.reshape(-1, h)
    if not fake_quant_enabled:
        # TODO(synk): observer-only path would update running min/max buffers
        # (stateful observer); output is unchanged, state update not modeled here.
        return x

    t = x2.shape[0]
    itemsize = jnp.dtype(x.dtype).itemsize
    vmem_cap = _vmem_capacity_bytes()
    num_cores = _num_tensorcores()

    if block_tokens is None:
        block_tokens = _pick_block_tokens(t, h, itemsize, itemsize, vmem_cap, num_cores)
    else:
        block_tokens = max(8, _round_up(int(block_tokens), 8))
    block_tokens = min(block_tokens, _round_up(t, 8))

    # Working set: double-buffered in+out blocks plus one f32 temp per element.
    working = block_tokens * h * (2 * (itemsize + itemsize) + 4)
    vmem_limit = min(
        int(vmem_cap * (0.85 if vmem_cap >= 96 * _MIB else 0.70)),
        max(32 * _MIB, working + 8 * _MIB),
    )

    kernel = functools.partial(
        _token_fake_quant_kernel,
        quant_min=QUANT_MIN,
        quant_max=QUANT_MAX,
        symmetric=SYMMETRIC,
    )
    grid = (_cdiv(t, block_tokens),)
    out = pl.pallas_call(
        kernel,
        out_shape=jax.ShapeDtypeStruct((t, h), x.dtype),
        grid_spec=pltpu.PrefetchScalarGridSpec(
            num_scalar_prefetch=0,
            grid=grid,
            in_specs=[pl.BlockSpec((block_tokens, h), lambda i: (i, 0))],
            out_specs=pl.BlockSpec((block_tokens, h), lambda i: (i, 0)),
        ),
        compiler_params=pltpu.CompilerParams(
            dimension_semantics=("parallel",),
            vmem_limit_bytes=vmem_limit,
        ),
        cost_estimate=pl.CostEstimate(
            flops=7 * t * h,
            transcendentals=0,
            bytes_accessed=2 * t * h * itemsize,
        ),
    )(x2)

    return out.reshape(org_shape)


def _reference(x):
    """Pure-JAX reference of the same forward pass (asymmetric path).

    Mirrors the kernel's (and PyTorch fake_quantize's) inv_scale-multiply path.
    Returns (output, per-row scale) so the test can tolerate rare 1-level flips
    from divide rounding at bin edges plus output-dtype rounding.
    """
    org_shape = x.shape
    x2 = x.reshape(-1, org_shape[-1]).astype(jnp.float32)
    min_neg = jnp.minimum(jnp.min(x2, axis=-1, keepdims=True), 0.0)
    max_pos = jnp.maximum(jnp.max(x2, axis=-1, keepdims=True), 0.0)
    scale = jnp.maximum((max_pos - min_neg) / float(QUANT_MAX - QUANT_MIN), EPS)
    zp = jnp.clip(QUANT_MIN - jnp.round(min_neg / scale), QUANT_MIN, QUANT_MAX)
    inv_scale = 1.0 / scale
    q = jnp.clip(jnp.round(x2 * inv_scale + zp), QUANT_MIN, QUANT_MAX)
    out = ((q - zp) * scale).reshape(org_shape).astype(x.dtype)
    return out, scale


def _check(x):
    y = token_fixed_fake_quantize(x, observer_enabled=1, fake_quant_enabled=1)
    y = jax.block_until_ready(y)
    assert y.shape == x.shape and y.dtype == x.dtype

    y_ref, scale_ref = _reference(x)
    h = x.shape[-1]
    yf = y.reshape(-1, h).astype(jnp.float32)
    rf = y_ref.reshape(-1, h).astype(jnp.float32)
    err = jnp.abs(yf - rf)

    # Output-dtype rounding allowance: bf16 keeps ~8 significand bits.
    dtype_eps = 2.0 ** -7 if x.dtype == jnp.bfloat16 else 2.0 ** -20
    mag = jnp.maximum(jnp.abs(rf), jnp.abs(yf))

    # No element may differ by more than one quant level (+ output rounding) ...
    tol = scale_ref + dtype_eps * mag + 1e-5
    assert bool(jnp.all(err <= tol)), "mismatch beyond one quant level vs reference"
    # ... and nearly all elements must match up to output-dtype precision.
    near = err <= dtype_eps * jnp.maximum(mag, 1.0) + 1e-5
    exact_frac = float(jnp.mean(near.astype(jnp.float32)))
    assert exact_frac >= 0.98, "too many off-by-one-level elements vs reference"
    return y


if __name__ == "__main__":
    key = jax.random.PRNGKey(0)

    # [batch, seq, hidden] = [2, 8, 32] -> 16 tokens x 32 hidden (unpadded H;
    # masked tail stores inside the kernel instead of pad/slice HBM round trips).
    x_f32 = jax.random.normal(key, (2, 8, 32), dtype=jnp.float32) * 3.0 + 0.5
    _check(x_f32)

    # Lane-dense bf16 path (H multiple of 128): halves HBM traffic, math in f32.
    x_bf16 = (jax.random.normal(jax.random.PRNGKey(0), (2, 8, 128),
                                dtype=jnp.float32) * 2.0 - 0.25).astype(jnp.bfloat16)
    _check(x_bf16)

    print("KERNEL_OK")
</pallas_src>

<mosaic_0001>
module attributes {stable_mosaic.version = 11 : i64} {
  func.func @_token_fake_quant_kernel(%arg0: i32, %arg1: memref<16x32xf32, #tpu.memory_space<vmem>>, %arg2: memref<16x32xf32, #tpu.memory_space<vmem>>) attributes {dimension_semantics = [#tpu.dimension_semantics<parallel>], iteration_bounds = array<i64: 1>, scalar_prefetch = 0 : i64, scratch_operands = 0 : i64, tpu.core_type = #tpu.core_type<tc>, window_params = [{transform_indices = @transform_0, window_bounds = array<i64: 16, 32>}, {transform_indices = @transform_1, window_bounds = array<i64: 16, 32>}]} {
    %c0 = arith.constant 0 : index
    %c0_0 = arith.constant 0 : index
    %0 = vector.load %arg1[%c0, %c0_0] : memref<16x32xf32, #tpu.memory_space<vmem>>, vector<16x32xf32>
    %cst = arith.constant dense<0x7F800000> : vector<16xf32>
    %1 = vector.multi_reduction <minimumf>, %0, %cst [1] : vector<16x32xf32> to vector<16xf32>
    %2 = vector.shape_cast %1 : vector<16xf32> to vector<16x1xf32>
    %cst_1 = arith.constant 0.000000e+00 : f32
    %3 = vector.broadcast %cst_1 : f32 to vector<16x1xf32>
    %4 = arith.minimumf %2, %3 : vector<16x1xf32>
    %cst_2 = arith.constant dense<0xFF800000> : vector<16xf32>
    %5 = vector.multi_reduction <maximumf>, %0, %cst_2 [1] : vector<16x32xf32> to vector<16xf32>
    %6 = vector.shape_cast %5 : vector<16xf32> to vector<16x1xf32>
    %cst_3 = arith.constant 0.000000e+00 : f32
    %7 = vector.broadcast %cst_3 : f32 to vector<16x1xf32>
    %8 = arith.maximumf %6, %7 : vector<16x1xf32>
    %9 = arith.subf %8, %4 : vector<16x1xf32>
    %cst_4 = arith.constant 2.550000e+02 : f32
    %10 = vector.broadcast %cst_4 : f32 to vector<16x1xf32>
    %11 = arith.divf %9, %10 : vector<16x1xf32>
    %cst_5 = arith.constant 1.1920929E-7 : f32
    %12 = vector.broadcast %cst_5 : f32 to vector<16x1xf32>
    %13 = arith.maximumf %11, %12 : vector<16x1xf32>
    %14 = arith.divf %4, %13 : vector<16x1xf32>
    %15 = math.roundeven %14 : vector<16x1xf32>
    %cst_6 = arith.constant 0.000000e+00 : f32
    %16 = vector.broadcast %cst_6 : f32 to vector<16x1xf32>
    %17 = arith.subf %16, %15 : vector<16x1xf32>
    %cst_7 = arith.constant 0.000000e+00 : f32
    %cst_8 = arith.constant 2.550000e+02 : f32
    %18 = vector.broadcast %cst_7 : f32 to vector<16x1xf32>
    %19 = arith.maximumf %18, %17 : vector<16x1xf32>
    %20 = vector.broadcast %cst_8 : f32 to vector<16x1xf32>
    %21 = arith.minimumf %20, %19 : vector<16x1xf32>
    %cst_9 = arith.constant 1.000000e+00 : f32
    %22 = vector.broadcast %cst_9 : f32 to vector<16x1xf32>
    %23 = arith.divf %22, %13 : vector<16x1xf32>
    %c0_10 = arith.constant 0 : index
    %c0_11 = arith.constant 0 : index
    %24 = vector.load %arg1[%c0_10, %c0_11] : memref<16x32xf32, #tpu.memory_space<vmem>>, vector<16x32xf32>
    %25 = vector.broadcast %23 : vector<16x1xf32> to vector<16x32xf32>
    %26 = arith.mulf %24, %25 : vector<16x32xf32>
    %27 = vector.broadcast %21 : vector<16x1xf32> to vector<16x32xf32>
    %28 = arith.addf %26, %27 : vector<16x32xf32>
    %29 = math.roundeven %28 : vector<16x32xf32>
    %cst_12 = arith.constant 0.000000e+00 : f32
    %cst_13 = arith.constant 2.550000e+02 : f32
    %30 = vector.broadcast %cst_12 : f32 to vector<16x32xf32>
    %31 = arith.maximumf %30, %29 : vector<16x32xf32>
    %32 = vector.broadcast %cst_13 : f32 to vector<16x32xf32>
    %33 = arith.minimumf %32, %31 : vector<16x32xf32>
    %34 = vector.broadcast %21 : vector<16x1xf32> to vector<16x32xf32>
    %35 = arith.subf %33, %34 : vector<16x32xf32>
    %36 = vector.broadcast %13 : vector<16x1xf32> to vector<16x32xf32>
    %37 = arith.mulf %35, %36 : vector<16x32xf32>
    %c0_14 = arith.constant 0 : index
    %c0_15 = arith.constant 0 : index
    %38 = vector.load %arg2[%c0_14, %c0_15] : memref<16x32xf32, #tpu.memory_space<vmem>>, vector<16x32xf32>
    tpu.vector_store %arg2[%c0_14, %c0_15], %37 {strides = array<i32>} : memref<16x32xf32, #tpu.memory_space<vmem>>, vector<16x32xf32>,
    return
  }
  func.func @transform_0(%arg0: i32) -> (i32, i32) {
    %c0_i32 = arith.constant 0 : i32
    %c0_i32_0 = arith.constant 0 : i32
    return %arg0, %c0_i32 : i32, i32
  }
  func.func @transform_1(%arg0: i32) -> (i32, i32) {
    %c0_i32 = arith.constant 0 : i32
    %c0_i32_0 = arith.constant 0 : i32
    return %arg0, %c0_i32 : i32, i32
  }
}

</mosaic_0001>

<bundles_post_ra>
// kernel: tpu_custom_call.1
= control target key start
LH: loop header
LB: loop body
LE: loop exit
PB: predicated region body
PF: predicated region fallthrough
CT: control target
= control target key end

     0   :  { %6 = vsyncpa [#allocation3], 0  ;;  %s286_s0 = inlined_call_operand.hbm [shape: f32[16,32], index: 0, kind: input, shape index: {}]   ;;  %s287_s1 = inlined_call_operand.hbm [shape: f32[16,32], index: 1, kind: output, shape index: {}]  }
   0x1   :  { %7 = vsyncpa [#allocation4], 0  ;;  %s12_s8 = sshll.u32 %s286_s0, 4  ;;  %s227_s9 = smov [#allocation2]   ;;  %s13_s8 = int_to_ptr.hbm [resolvable:$true] %s12_s8 }
   0x2   :  { %s14_s10 = sshll.u32 %s227_s9, 4  ;;  %s228_s11 = smov 128   ;;  %s15_s10 = int_to_ptr.vmem [resolvable:$true] %s14_s10 }
   0x3   :  { %s229_s12 = smov 8  }
   0x4   :  { %20 = dma.hbm_to_vmem [thread:$0]  %s13_s8, 256, %s15_s10, [#allocation3], %s228_s11, %s228_s11, %s229_s12  }
   0x5   :  { %223 = dma.done.wait [#allocation3], 256  }
   0x6   :  { %224 = vsyncadd [#allocation3], 4294967040  ;;  %vm27_vm0 = vcmask 261120   ;;  %v248_v0 = vld [vmem:[#allocation2] sm:$0xff]  ;;  %v254_v3 = vld [vmem:[#allocation2 + $0x8] sm:$0xff]  ;;  %v230_v6 = vmov 255.0  }
   0x7   :  { %v36_v1 = vsel %vm27_vm0, %v248_v0, -inf  ;;  %v28_v2 = vsel %vm27_vm0, %v248_v0, inf  ;;  %v39_v4 = vsel %vm27_vm0, %v254_v3, -inf  ;;  %v31_v5 = vsel %vm27_vm0, %v254_v3, inf  ;;  %s231_s0 = smov [#allocation5]   ;;  %s119_s16 = sshll.u32 %s287_s1, 4  ;;  %s120_s16 = int_to_ptr.hbm [resolvable:$true] %s119_s16 }
   0x8   :  { %37 = vmax.xlane.f32.xlu1 %v36_v1  ;;  %29 = vmin.xlane.f32.xlu0 %v28_v2  ;;  %169 = vrcp.f32 %v230_v6  ;;  %s117_s13 = sshll.u32 %s231_s0, 4  ;;  %s118_s13 = int_to_ptr.vmem [resolvable:$true] %s117_s13 }
   0xe   :  { %v170_v7 = vpop.eup %169 }
   0xf   :  { %v47_v8 = vmul.f32 255.0, %v170_v7  ;;  %vm51_vm1 = vweird.f32 %v170_v7 }
  0x10   :  { %40 = vmax.xlane.f32.xlu1 %v39_v4  ;;  %32 = vmin.xlane.f32.xlu0 %v31_v5 }
  0x11   :  { %v48_v9 = vsub.f32 1.0, %v47_v8 }
  0x13   :  { %v49_v10 = vmul.f32 %v170_v7, %v48_v9 }
  0x15   :  { %v50_v11 = vadd.f32 %v170_v7, %v49_v10 }
  0x17   :  { %v52_v16 = vsel %vm51_vm1, %v170_v7, %v50_v11 }
  0x7b   :  { %v38_v12 = vpop.xlane.xlu1 %37  ;;  %v30_v13 = vpop.xlane.xlu0 %29 }
  0x7c   :  { %v42_v14 = vmax.f32 %v38_v12, 0.0  ;;  %v34_v15 = vmin.f32 %v30_v13, 0.0 }
  0x7e   :  { %v44_v17 = vsub.f32 %v42_v14, %v34_v15 }
  0x80   :  { %v53_v18 = vmul.f32 %v52_v16, %v44_v17 }
  0x82   :  { %v260_v19 = vmax.f32 %v53_v18, 1.1920929e-07 }
  0x83   :  { %v41_v20 = vpop.xlane.xlu1 %40  ;;  %v33_v21 = vpop.xlane.xlu0 %32 }
  0x84   :  { %171 = vrcp.f32 %v260_v19  ;;  %v43_v22 = vmax.f32 %v41_v20, 0.0  ;;  %v35_v23 = vmin.f32 %v33_v21, 0.0  ;;  %v68_v30 = vand.u32 2147483648, %v260_v19 }
  0x85   :  { %v66_v32 = vand.u32 2147483647, %v260_v19  ;;  %vm62_vm3 = vweird.f32 %v260_v19 }
  0x86   :  { %v45_v24 = vsub.f32 %v43_v22, %v35_v23  ;;  %v69_v34 = vor.u32 1.1754944e-38, %v68_v30 }
  0x87   :  { %vm67_vm5 = vcmp.eq.f32.partialorder %v66_v32, 8.507059e+37 }
  0x88   :  { %v54_v25 = vmul.f32 %v52_v16, %v45_v24 }
  0x8a   :  { %v172_v26 = vpop.eup %171  ;;  %v264_v28 = vmax.f32 %v54_v25, 1.1920929e-07 }
  0x8b   :  { %v58_v27 = vmul.f32 %v172_v26, %v260_v19  ;;  %vm63_vm2 = vweird.f32 %v172_v26 }
  0x8c   :  { %173 = vrcp.f32 %v264_v28  ;;  %vm64_vm4 = vmor %vm62_vm3, %vm63_vm2  ;;  %v83_v42 = vand.u32 2147483648, %v264_v28  ;;  %v81_v44 = vand.u32 2147483647, %v264_v28  ;;  %vm77_vm7 = vweird.f32 %v264_v28 }
  0x8d   :  { %v59_v29 = vsub.f32 1.0, %v58_v27 }
  0x8e   :  { %v84_v50 = vor.u32 1.1754944e-38, %v83_v42  ;;  %vm82_vm9 = vcmp.eq.f32.partialorder %v81_v44, 8.507059e+37 }
  0x8f   :  { %v60_v31 = vmul.f32 %v172_v26, %v59_v29 }
  0x91   :  { %v61_v33 = vadd.f32 %v172_v26, %v60_v31 }
  0x92   :  { %v174_v35 = vpop.eup %173 }
  0x93   :  { %v65_v36 = vsel %vm64_vm4, %v172_v26, %v61_v33  ;;  %v73_v38 = vmul.f32 %v174_v35, %v264_v28  ;;  %vm78_vm6 = vweird.f32 %v174_v35 }
  0x94   :  { %v70_v37 = vsel %vm67_vm5, %v69_v34, %v65_v36  ;;  %vm79_vm8 = vmor %vm77_vm7, %vm78_vm6 }
  0x95   :  { %v71_v39 = vmul.f32 %v70_v37, %v34_v15  ;;  %v74_v40 = vsub.f32 1.0, %v73_v38  ;;  %v97_v62 = vmul.f32 %v70_v37, %v248_v0 }
  0x97   :  { %v134_v41 = vcvt.f32.s32 %v71_v39  ;;  %v75_v43 = vmul.f32 %v174_v35, %v74_v40  ;;  %v132_v46 = vand.u32 2147483647, %v71_v39  ;;  %v137_v49 = vand.u32 2147483648, %v71_v39 }
  0x99   :  { %v135_v45 = vcvt.s32.f32 %v134_v41  ;;  %v76_v47 = vadd.f32 %v174_v35, %v75_v43  ;;  %vm133_vm10 = vcmp.lt.f32.partialorder %v132_v46, 8388608.0 }
  0x9b   :  { %v136_v48 = vand.u32 2147483647, %v135_v45  ;;  %v80_v51 = vsel %vm79_vm8, %v174_v35, %v76_v47 }
  0x9c   :  { %v85_v53 = vsel %vm82_vm9, %v84_v50, %v80_v51 }
  0x9d   :  { %v138_v52 = vor.u32 %v137_v49, %v136_v48  ;;  %v86_v54 = vmul.f32 %v85_v53, %v35_v23  ;;  %v98_v14 = vmul.f32 %v85_v53, %v254_v3 }
  0x9f   :  { %v139_v55 = vsel %vm133_vm10, %v138_v52, %v71_v39  ;;  %v142_v57 = vcvt.f32.s32 %v86_v54  ;;  %v140_v60 = vand.u32 2147483647, %v86_v54  ;;  %v145_v1 = vand.u32 2147483648, %v86_v54 }
  0xa0   :  { %v89_v56 = vsub.f32 0.0, %v139_v55 }
  0xa1   :  { %v143_v59 = vcvt.s32.f32 %v142_v57  ;;  %vm141_vm11 = vcmp.lt.f32.partialorder %v140_v60, 8388608.0 }
  0xa2   :  { %v91_v58 = vmax.f32 %v89_v56, 0.0 }
  0xa3   :  { %v144_v63 = vand.u32 2147483647, %v143_v59 }
  0xa4   :  { %v93_v61 = vmin.f32 %v91_v58, 255.0 }
  0xa5   :  { %v146_v4 = vor.u32 %v145_v1, %v144_v63 }
  0xa6   :  { %v99_v2 = vadd.f32 %v97_v62, %v93_v61 }
  0xa7   :  { %v147_v6 = vsel %vm141_vm11, %v146_v4, %v86_v54 }
  0xa8   :  { %v150_v5 = vcvt.f32.s32 %v99_v2  ;;  %v90_v7 = vsub.f32 0.0, %v147_v6  ;;  %v148_v9 = vand.u32 2147483647, %v99_v2  ;;  %v153_v12 = vand.u32 2147483648, %v99_v2 }
  0xaa   :  { %v151_v8 = vcvt.s32.f32 %v150_v5  ;;  %v92_v10 = vmax.f32 %v90_v7, 0.0  ;;  %vm149_vm12 = vcmp.lt.f32.partialorder %v148_v9, 8388608.0 }
  0xac   :  { %v152_v11 = vand.u32 2147483647, %v151_v8  ;;  %v94_v13 = vmin.f32 %v92_v10, 255.0 }
  0xae   :  { %v154_v15 = vor.u32 %v153_v12, %v152_v11  ;;  %v100_v16 = vadd.f32 %v98_v14, %v94_v13 }
  0xb0   :  { %v155_v0 = vsel %vm149_vm12, %v154_v15, %v99_v2  ;;  %v158_v18 = vcvt.f32.s32 %v100_v16  ;;  %v156_v22 = vand.u32 2147483647, %v100_v16  ;;  %v161_v25 = vand.u32 2147483648, %v100_v16 }
  0xb1   :  { %v103_v17 = vmax.f32 %v155_v0, 0.0 }
  0xb2   :  { %v159_v21 = vcvt.s32.f32 %v158_v18  ;;  %vm157_vm13 = vcmp.lt.f32.partialorder %v156_v22, 8388608.0 }
  0xb3   :  { %v105_v20 = vmin.f32 %v103_v17, 255.0 }
  0xb4   :  { %v160_v24 = vand.u32 2147483647, %v159_v21 }
  0xb5   :  { %v107_v23 = vsub.f32 %v105_v20, %v93_v61 }
  0xb6   :  { %v162_v26 = vor.u32 %v161_v25, %v160_v24 }
  0xb7   :  { %v109_v27 = vmul.f32 %v107_v23, %v260_v19 }
  0xb8   :  { %v163_v29 = vsel %vm157_vm13, %v162_v26, %v100_v16 }
  0xb9   :  { %111 = vst.msk [vmem:[#allocation5] sm:$0xff] %vm27_vm0, %v109_v27  ;;  %v104_v3 = vmax.f32 %v163_v29, 0.0 }
  0xbb   :  { %v106_v30 = vmin.f32 %v104_v3, 255.0 }
  0xbd   :  { %v108_v31 = vsub.f32 %v106_v30, %v94_v13 }
  0xbf   :  { %v110_v32 = vmul.f32 %v108_v31, %v264_v28 }
  0xc1   :  { %112 = vst.msk [vmem:[#allocation5 + $0x8] sm:$0xff] %vm27_vm0, %v110_v32 }
  0xc2   :  { %125 = dma.vmem_to_hbm [thread:$0]  %s118_s13, 256, %s120_s16, [#allocation4], %s228_s11, %s228_s11, %s229_s12  }
  0xc3   :  { %225 = dma.done.wait [#allocation4], 256  }
  0xc4   :  { %226 = vsyncadd [#allocation4], 4294967040 }
  0xc5   :  { %130 = vsyncpa [#allocation3], 1 }
  0xc6   :  { %131 = vsyncpa [#allocation4], 1 }

</bundles_post_ra>
